<compile_context>
chip_gen: v7x
topology: tpu7x:2x2x1
jax: 0.10.0
libtpu: 0.0.40
codegen_flags: <defaults>
</compile_context>

<pallas_src>
import functools

import jax
import jax.numpy as jnp
from jax.experimental import pallas as pl
from jax.experimental.pallas import tpu as pltpu


HIDDEN = 128      # trunk width == fused-head width
HEAD_HIDDEN = 64  # per-stream hidden width
OUT_PAD = 128     # lane-dense padded output width
V_COL = 127       # lane holding the value-stream output inside the fused head


def _round_up(x, m):
    return ((x + m - 1) // m) * m


def dueling_dqn_kernel(x_ref, w1_ref, wstk_ref, b_ref, q_ref, *, out_dim):
    inv_out = 1.0 / float(out_dim)

    # In-kernel f32 -> bf16 cast of the activations (no wrapper pass over x).
    x = x_ref[...].astype(jnp.bfloat16)                              # (BT, in)

    # feature trunk: Linear -> ReLU -> Linear -> ReLU  (f32 accumulation)
    h = jnp.dot(x, w1_ref[...], preferred_element_type=jnp.float32) + b_ref[0:1, :]
    h = jnp.maximum(h, 0.0).astype(jnp.bfloat16)
    h = jnp.dot(h, wstk_ref[0], preferred_element_type=jnp.float32) + b_ref[1:2, :]
    h = jnp.maximum(h, 0.0).astype(jnp.bfloat16)

    # fused heads, layer 1: lanes [0:64) = value hidden, [64:128) = advantage hidden
    hh = jnp.dot(h, wstk_ref[1], preferred_element_type=jnp.float32) + b_ref[2:3, :]
    hh = jnp.maximum(hh, 0.0).astype(jnp.bfloat16)

    # fused heads, layer 2 (block-diagonal, lane-padded to 128):
    #   lanes [0:out_dim)     -> advantages
    #   lanes [out_dim:V_COL) -> exactly zero (zero weights & bias)
    #   lane  V_COL           -> value
    f = jnp.dot(hh, wstk_ref[2], preferred_element_type=jnp.float32) + b_ref[3:4, :]

    v = f[:, V_COL:V_COL + 1]                                        # (BT, 1)
    a_sum = jnp.sum(f, axis=1, keepdims=True) - v                    # padded lanes are 0
    a_mean = a_sum * inv_out                                         # divide by TRUE out_dim

    # lanes [0:out_dim) hold q = v + (a - mean(a)); other lanes are garbage and
    # get sliced off in the wrapper (store stays lane-dense / unmasked).
    q_ref[...] = (f + (v - a_mean)).astype(q_ref.dtype)


def prepare_params(params, out_dim):
    """One-time repack: transpose to (in, out), fuse heads, stack weights, pack biases."""
    assert out_dim < V_COL, "out_dim must be < 127 for the lane-packed fused head"
    f32, bf16 = jnp.float32, jnp.bfloat16

    w1 = jnp.asarray(params["w1"], f32).T.astype(bf16)               # (in, 128)
    w2 = jnp.asarray(params["w2"], f32).T                            # (128, 128)

    # fused head layer 1: [wv1 | wa1] -> (128, 128)
    wh1 = jnp.concatenate([jnp.asarray(params["wv1"], f32).T,
                           jnp.asarray(params["wa1"], f32).T], axis=1)

    # fused head layer 2: block-diagonal, padded to 128 output lanes.
    wh2 = jnp.zeros((HIDDEN, OUT_PAD), f32)
    wh2 = wh2.at[HEAD_HIDDEN:, :out_dim].set(jnp.asarray(params["wa2"], f32).T)   # adv
    wh2 = wh2.at[:HEAD_HIDDEN, V_COL].set(jnp.asarray(params["wv2"], f32)[0])     # value

    wstk = jnp.stack([w2, wh1, wh2], axis=0).astype(bf16)            # (3, 128, 128)

    # All biases packed into one lane-aligned (8, 128) f32 slab (rows 0..3 used).
    b = jnp.zeros((8, OUT_PAD), f32)
    b = b.at[0, :].set(jnp.asarray(params["b1"], f32))
    b = b.at[1, :].set(jnp.asarray(params["b2"], f32))
    b = b.at[2, :].set(jnp.concatenate([jnp.asarray(params["bv1"], f32),
                                        jnp.asarray(params["ba1"], f32)]))
    b = b.at[3, :out_dim].set(jnp.asarray(params["ba2"], f32))
    b = b.at[3, V_COL].set(jnp.asarray(params["bv2"], f32)[0])

    return dict(w1=w1, wstk=wstk, b=b)


def _choose_batch_tile(B, max_batch_tile):
    """Batch tile: multiple of 16; big (amortize per-step overhead); for large
    batches split so the parallel grid has >= 2 steps (v7x's two TensorCores)
    while keeping tiles >= 256 rows (v6e/v7x MXU fill)."""
    if B >= 512:
        bt = _round_up(-(-B // 2), 16)
    else:
        bt = _round_up(max(B, 1), 16)
    return max(16, min(_round_up(max_batch_tile, 16), bt))


def dueling_dqn_forward(x, prepared, out_dim, *, max_batch_tile=2048):
    """x: (B, in_dim) float32 (passed as-is — no pad/cast pass). Returns (B, out_dim) f32."""
    B, in_dim = x.shape
    x = jnp.asarray(x, jnp.float32)

    BT = _choose_batch_tile(B, max_batch_tile)
    grid = pl.cdiv(B, BT)
    B_out = grid * BT          # padded output rows, allocated by pallas_call (no copy)

    w1, wstk, b = prepared["w1"], prepared["wstk"], prepared["b"]

    in_specs = [
        pl.BlockSpec((BT, in_dim), lambda i: (i, 0)),                 # x (ragged last tile OK)
        pl.BlockSpec((in_dim, HIDDEN), lambda i: (0, 0)),             # w1 (resident)
        pl.BlockSpec((3, HIDDEN, HIDDEN), lambda i: (0, 0, 0)),       # stacked w2/wh1/wh2
        pl.BlockSpec((8, OUT_PAD), lambda i: (0, 0)),                 # packed biases
    ]
    out_specs = pl.BlockSpec((BT, OUT_PAD), lambda i: (i, 0))

    flops = 2 * B_out * (in_dim * HIDDEN + 3 * HIDDEN * HIDDEN)
    bytes_accessed = (B * in_dim * 4 + B_out * OUT_PAD * 2
                      + int(w1.size) * 2 + int(wstk.size) * 2 + int(b.size) * 4)

    q_pad = pl.pallas_call(
        functools.partial(dueling_dqn_kernel, out_dim=out_dim),
        out_shape=jax.ShapeDtypeStruct((B_out, OUT_PAD), jnp.bfloat16),
        grid=(grid,),
        in_specs=in_specs,
        out_specs=out_specs,
        compiler_params=pltpu.CompilerParams(dimension_semantics=("parallel",)),
        cost_estimate=pl.CostEstimate(flops=flops, transcendentals=0,
                                      bytes_accessed=bytes_accessed),
    )(x, w1, wstk, b)

    # Only lanes [0:out_dim) of rows [0:B) are valid — never reduce over q_pad directly.
    return q_pad[:B, :out_dim].astype(jnp.float32)


def init_params(key, in_dim, out_dim):
    """Deterministic init mimicking PyTorch default Linear init (PyTorch (out, in) layout)."""
    def linear(key, fan_in, fan_out):
        kw, kb = jax.random.split(key)
        bound = 1.0 / jnp.sqrt(jnp.float32(fan_in))
        w = jax.random.uniform(kw, (fan_out, fan_in), jnp.float32, -bound, bound)
        b = jax.random.uniform(kb, (fan_out,), jnp.float32, -bound, bound)
        return w, b

    keys = jax.random.split(key, 6)
    w1, b1 = linear(keys[0], in_dim, 128)
    w2, b2 = linear(keys[1], 128, 128)
    wv1, bv1 = linear(keys[2], 128, 64)
    wv2, bv2 = linear(keys[3], 64, 1)
    wa1, ba1 = linear(keys[4], 128, 64)
    wa2, ba2 = linear(keys[5], 64, out_dim)
    return dict(w1=w1, b1=b1, w2=w2, b2=b2,
                wv1=wv1, bv1=bv1, wv2=wv2, bv2=bv2,
                wa1=wa1, ba1=ba1, wa2=wa2, ba2=ba2)


def reference_forward(x, p):
    """Pure-f32 JAX reference matching the PyTorch module semantics."""
    h = jnp.maximum(x @ p["w1"].T + p["b1"], 0.0)
    h = jnp.maximum(h @ p["w2"].T + p["b2"], 0.0)
    v = jnp.maximum(h @ p["wv1"].T + p["bv1"], 0.0)
    v = v @ p["wv2"].T + p["bv2"]
    a = jnp.maximum(h @ p["wa1"].T + p["ba1"], 0.0)
    a = a @ p["wa2"].T + p["ba2"]
    return v + (a - a.mean(axis=1, keepdims=True))


if __name__ == "__main__":
    key = jax.random.PRNGKey(0)
    k_params, k_x = jax.random.split(key)

    B, in_dim, out_dim = 8, 32, 8
    params = init_params(k_params, in_dim, out_dim)
    prepared = prepare_params(params, out_dim)   # one-time repack (no per-call transposes)
    x = jax.random.normal(k_x, (B, in_dim), jnp.float32)

    q = dueling_dqn_forward(x, prepared, out_dim)
    q = jax.block_until_ready(q)

    q_ref = reference_forward(x, params)
    assert q.shape == (B, out_dim)
    # bf16 MXU inputs + bf16 output store (f32 accumulation) vs pure-f32 reference.
    assert jnp.allclose(q, q_ref, atol=5e-2, rtol=5e-2), "mismatch vs reference"

    print("KERNEL_OK")
</pallas_src>

<mosaic_0001>
module attributes {stable_mosaic.version = 11 : i64} {
  func.func @dueling_dqn_kernel(%arg0: i32, %arg1: memref<16x32xf32, #tpu.memory_space<vmem>>, %arg2: memref<32x128xbf16, #tpu.memory_space<vmem>>, %arg3: memref<3x128x128xbf16, #tpu.memory_space<vmem>>, %arg4: memref<8x128xf32, #tpu.memory_space<vmem>>, %arg5: memref<16x128xbf16, #tpu.memory_space<vmem>>) attributes {dimension_semantics = [#tpu.dimension_semantics<parallel>], iteration_bounds = array<i64: 1>, scalar_prefetch = 0 : i64, scratch_operands = 0 : i64, tpu.core_type = #tpu.core_type<tc>, window_params = [{transform_indices = @transform_0, window_bounds = array<i64: 16, 32>}, {pipeline_mode = #tpu.pipeline_mode<synchronous>, transform_indices = @transform_1, window_bounds = array<i64: 32, 128>}, {pipeline_mode = #tpu.pipeline_mode<synchronous>, transform_indices = @transform_2, window_bounds = array<i64: 3, 128, 128>}, {pipeline_mode = #tpu.pipeline_mode<synchronous>, transform_indices = @transform_3, window_bounds = array<i64: 8, 128>}, {transform_indices = @transform_4, window_bounds = array<i64: 16, 128>}]} {
    %c0 = arith.constant 0 : index
    %c0_0 = arith.constant 0 : index
    %0 = vector.load %arg1[%c0, %c0_0] : memref<16x32xf32, #tpu.memory_space<vmem>>, vector<16x32xf32>
    %1 = arith.truncf %0 : vector<16x32xf32> to vector<16x32xbf16>
    %c0_1 = arith.constant 0 : index
    %c0_2 = arith.constant 0 : index
    %2 = vector.load %arg2[%c0_1, %c0_2] : memref<32x128xbf16, #tpu.memory_space<vmem>>, vector<32x128xbf16>
    %cst = arith.constant dense<0.000000e+00> : vector<16x128xf32>
    %3 = tpu.matmul %1, %2, %cst {dimension_numbers = #tpu.dot_dimension_numbers<[1], [0], [0], [1], [0, 0, 1, 1], [], []>} : vector<16x32xbf16>, vector<32x128xbf16>, vector<16x128xf32> -> vector<16x128xf32>
    %c0_3 = arith.constant 0 : index
    %c0_4 = arith.constant 0 : index
    %4 = vector.load %arg4[%c0_3, %c0_4] : memref<8x128xf32, #tpu.memory_space<vmem>>, vector<1x128xf32>
    %5 = vector.broadcast %4 : vector<1x128xf32> to vector<16x128xf32>
    %6 = arith.addf %3, %5 : vector<16x128xf32>
    %cst_5 = arith.constant 0.000000e+00 : f32
    %7 = vector.broadcast %cst_5 : f32 to vector<16x128xf32>
    %8 = arith.maximumf %6, %7 : vector<16x128xf32>
    %9 = arith.truncf %8 : vector<16x128xf32> to vector<16x128xbf16>
    %c0_6 = arith.constant 0 : index
    %c0_7 = arith.constant 0 : index
    %c0_8 = arith.constant 0 : index
    %10 = vector.load %arg3[%c0_6, %c0_7, %c0_8] : memref<3x128x128xbf16, #tpu.memory_space<vmem>>, vector<1x128x128xbf16>
    %11 = vector.shape_cast %10 : vector<1x128x128xbf16> to vector<128x128xbf16>
    %cst_9 = arith.constant dense<0.000000e+00> : vector<16x128xf32>
    %12 = tpu.matmul %9, %11, %cst_9 {dimension_numbers = #tpu.dot_dimension_numbers<[1], [0], [0], [1], [0, 0, 1, 1], [], []>} : vector<16x128xbf16>, vector<128x128xbf16>, vector<16x128xf32> -> vector<16x128xf32>
    %c1 = arith.constant 1 : index
    %c0_10 = arith.constant 0 : index
    %13 = vector.load %arg4[%c1, %c0_10] : memref<8x128xf32, #tpu.memory_space<vmem>>, vector<1x128xf32>
    %14 = vector.broadcast %13 : vector<1x128xf32> to vector<16x128xf32>
    %15 = arith.addf %12, %14 : vector<16x128xf32>
    %cst_11 = arith.constant 0.000000e+00 : f32
    %16 = vector.broadcast %cst_11 : f32 to vector<16x128xf32>
    %17 = arith.maximumf %15, %16 : vector<16x128xf32>
    %18 = arith.truncf %17 : vector<16x128xf32> to vector<16x128xbf16>
    %c1_12 = arith.constant 1 : index
    %c0_13 = arith.constant 0 : index
    %c0_14 = arith.constant 0 : index
    %19 = vector.load %arg3[%c1_12, %c0_13, %c0_14] : memref<3x128x128xbf16, #tpu.memory_space<vmem>>, vector<1x128x128xbf16>
    %20 = vector.shape_cast %19 : vector<1x128x128xbf16> to vector<128x128xbf16>
    %cst_15 = arith.constant dense<0.000000e+00> : vector<16x128xf32>
    %21 = tpu.matmul %18, %20, %cst_15 {dimension_numbers = #tpu.dot_dimension_numbers<[1], [0], [0], [1], [0, 0, 1, 1], [], []>} : vector<16x128xbf16>, vector<128x128xbf16>, vector<16x128xf32> -> vector<16x128xf32>
    %c2 = arith.constant 2 : index
    %c0_16 = arith.constant 0 : index
    %22 = vector.load %arg4[%c2, %c0_16] : memref<8x128xf32, #tpu.memory_space<vmem>>, vector<1x128xf32>
    %23 = vector.broadcast %22 : vector<1x128xf32> to vector<16x128xf32>
    %24 = arith.addf %21, %23 : vector<16x128xf32>
    %cst_17 = arith.constant 0.000000e+00 : f32
    %25 = vector.broadcast %cst_17 : f32 to vector<16x128xf32>
    %26 = arith.maximumf %24, %25 : vector<16x128xf32>
    %27 = arith.truncf %26 : vector<16x128xf32> to vector<16x128xbf16>
    %c2_18 = arith.constant 2 : index
    %c0_19 = arith.constant 0 : index
    %c0_20 = arith.constant 0 : index
    %28 = vector.load %arg3[%c2_18, %c0_19, %c0_20] : memref<3x128x128xbf16, #tpu.memory_space<vmem>>, vector<1x128x128xbf16>
    %29 = vector.shape_cast %28 : vector<1x128x128xbf16> to vector<128x128xbf16>
    %cst_21 = arith.constant dense<0.000000e+00> : vector<16x128xf32>
    %30 = tpu.matmul %27, %29, %cst_21 {dimension_numbers = #tpu.dot_dimension_numbers<[1], [0], [0], [1], [0, 0, 1, 1], [], []>} : vector<16x128xbf16>, vector<128x128xbf16>, vector<16x128xf32> -> vector<16x128xf32>
    %c3 = arith.constant 3 : index
    %c0_22 = arith.constant 0 : index
    %31 = vector.load %arg4[%c3, %c0_22] : memref<8x128xf32, #tpu.memory_space<vmem>>, vector<1x128xf32>
    %32 = vector.broadcast %31 : vector<1x128xf32> to vector<16x128xf32>
    %33 = arith.addf %30, %32 : vector<16x128xf32>
    %34 = vector.extract_strided_slice %33 {offsets = [0, 127], sizes = [16, 1], strides = [1, 1]} : vector<16x128xf32> to vector<16x1xf32>
    %cst_23 = arith.constant dense<0.000000e+00> : vector<16xf32>
    %35 = vector.multi_reduction <add>, %33, %cst_23 [1] : vector<16x128xf32> to vector<16xf32>
    %36 = vector.shape_cast %35 : vector<16xf32> to vector<16x1xf32>
    %37 = arith.subf %36, %34 : vector<16x1xf32>
    %cst_24 = arith.constant 1.250000e-01 : f32
    %38 = vector.broadcast %cst_24 : f32 to vector<16x1xf32>
    %39 = arith.mulf %37, %38 : vector<16x1xf32>
    %40 = arith.subf %34, %39 : vector<16x1xf32>
    %41 = vector.broadcast %40 : vector<16x1xf32> to vector<16x128xf32>
    %42 = arith.addf %33, %41 : vector<16x128xf32>
    %43 = arith.truncf %42 : vector<16x128xf32> to vector<16x128xbf16>
    %c0_25 = arith.constant 0 : index
    %c0_26 = arith.constant 0 : index
    %44 = vector.load %arg5[%c0_25, %c0_26] : memref<16x128xbf16, #tpu.memory_space<vmem>>, vector<16x128xbf16>
    tpu.vector_store %arg5[%c0_25, %c0_26], %43 {strides = array<i32>} : memref<16x128xbf16, #tpu.memory_space<vmem>>, vector<16x128xbf16>,
    return
  }
  func.func @transform_0(%arg0: i32) -> (i32, i32) {
    %c0_i32 = arith.constant 0 : i32
    %c0_i32_0 = arith.constant 0 : i32
    return %arg0, %c0_i32 : i32, i32
  }
  func.func @transform_1(%arg0: i32) -> (i32, i32) {
    %c0_i32 = arith.constant 0 : i32
    %c0_i32_0 = arith.constant 0 : i32
    %c0_i32_1 = arith.constant 0 : i32
    return %c0_i32, %c0_i32_0 : i32, i32
  }
  func.func @transform_2(%arg0: i32) -> (i32, i32, i32) {
    %c0_i32 = arith.constant 0 : i32
    %c0_i32_0 = arith.constant 0 : i32
    %c0_i32_1 = arith.constant 0 : i32
    %c0_i32_2 = arith.constant 0 : i32
    return %c0_i32, %c0_i32_0, %c0_i32_1 : i32, i32, i32
  }
  func.func @transform_3(%arg0: i32) -> (i32, i32) {
    %c0_i32 = arith.constant 0 : i32
    %c0_i32_0 = arith.constant 0 : i32
    %c0_i32_1 = arith.constant 0 : i32
    return %c0_i32, %c0_i32_0 : i32, i32
  }
  func.func @transform_4(%arg0: i32) -> (i32, i32) {
    %c0_i32 = arith.constant 0 : i32
    %c0_i32_0 = arith.constant 0 : i32
    return %arg0, %c0_i32 : i32, i32
  }
}

</mosaic_0001>

<bundles_post_ra>
// kernel: tpu_custom_call.1
= control target key start
LH: loop header
LB: loop body
LE: loop exit
PB: predicated region body
PF: predicated region fallthrough
CT: control target
= control target key end

     0   :  { %9 = vsyncpa [#allocation3], 0  ;;  %s930_s0 = inlined_call_operand.hbm [shape: f32[8,32], index: 0, kind: input, shape index: {}]   ;;  %s931_s1 = inlined_call_operand.hbm [shape: bf16[32,128], index: 1, kind: input, shape index: {}]   ;;  %s932_s2 = inlined_call_operand.hbm [shape: bf16[3,128,128], index: 2, kind: input, shape index: {}]   ;;  %s933_s3 = inlined_call_operand.vmem [shape: f32[8,128], index: 3, kind: input, shape index: {}]   ;;  %s934_s4 = inlined_call_operand.hbm [shape: bf16[16,128], index: 4, kind: output, shape index: {}]  }
   0x1   :  { %10 = vsyncpa [#allocation6], 0 }
   0x2   :  { %11 = vsyncpa [#allocation4], 0 }
   0x3   :  { %16 = vsyncadd [#allocation3], 128  ;;  %s791_s15 = smov [#allocation5]   ;;  %s697_s19 = scalar_lea.hbm %s931_s1, 256 }
   0x4   :  { %s29_s16 = sshll.u32 %s791_s15, 4  ;;  %p698_p0 = scmp.ne.s32.totalorder %s931_s1, %s697_s19  ;;  %s30_s16 = int_to_ptr.vmem [resolvable:$true] %s29_s16 }
   0x5   :  { %p701_p1 = scmp.lt.u32.totalorder %s697_s19, %s931_s1 }
   0x7   :  { %p703_p2 = pnand %p701_p1, %p698_p0 }
   0x9   :  { %706 = shalt.err (!%p703_p2)
}
   0xa   :  { %s707_s24 = scalar_lea.vmem %s30_s16, 256  ;;  %p712_p4 = scmp.lt.s32.totalorder %s30_s16, %s30_s16 }
   0xb   :  { %p708_p3 = scmp.ne.s32.totalorder %s30_s16, %s707_s24  ;;  %p713_p5 = scmp.lt.s32.totalorder %s707_s24, %s707_s24 }
   0xd   :  { %p714_p6 = por %p713_p5, %p712_p4 }
   0xf   :  { %p715_p7 = pnand %p714_p6, %p708_p3 }
  0x11   :  { %718 = shalt.err (!%p715_p7)
}
  0x12   :  { %s792_s25 = smov 64   ;;  %s793_s26 = smov 4  }
  0x13   :  { %35 = dma.hbm_to_vmem [thread:$0]  %s931_s1, 256, %s30_s16, [#allocation6], %s792_s25, %s792_s25, %s793_s26  }
  0x14   :  { %s794_s29 = smov [#allocation2]   ;;  %s719_s7 = scalar_lea.hbm %s930_s0, 128 }
  0x15   :  { %s17_s30 = sshll.u32 %s794_s29, 4  ;;  %p720_p8 = scmp.ne.s32.totalorder %s930_s0, %s719_s7  ;;  %s18_s30 = int_to_ptr.vmem [resolvable:$true] %s17_s30 }
  0x16   :  { %p723_p9 = scmp.lt.u32.totalorder %s719_s7, %s930_s0 }
  0x18   :  { %p725_p10 = pnand %p723_p9, %p720_p8 }
  0x1a   :  { %728 = shalt.err (!%p725_p10)
}
  0x1b   :  { %s729_s12 = scalar_lea.vmem %s18_s30, 128  ;;  %s733_s1 = scalar_lea.vmem %s18_s30, 256 }
  0x1c   :  { %p730_p11 = scmp.ne.s32.totalorder %s18_s30, %s729_s12  ;;  %p734_p12 = scmp.lt.s32.totalorder %s18_s30, %s18_s30 }
  0x1d   :  { %p735_p13 = scmp.lt.s32.totalorder %s733_s1, %s729_s12 }
  0x1f   :  { %p736_p0 = por %p735_p13, %p734_p12 }
  0x21   :  { %p737_p1 = pnand %p736_p0, %p730_p11 }
  0x23   :  { %740 = shalt.err (!%p737_p1)
}
  0x24   :  { %s795_s13 = smov 128   ;;  %s796_s14 = smov 8  }
  0x25   :  { %23 = dma.hbm_to_vmem [thread:$0]  %s930_s0, 128, %s18_s30, [#allocation3], %s795_s13, %s795_s13, %s796_s14  }
  0x26   :  { %s797_s17 = smov [#allocation7]   ;;  %s741_s21 = scalar_lea.hbm %s932_s2, 3072 }
  0x27   :  { %s41_s18 = sshll.u32 %s797_s17, 4  ;;  %p742_p2 = scmp.ne.s32.totalorder %s932_s2, %s741_s21  ;;  %s42_s18 = int_to_ptr.vmem [resolvable:$true] %s41_s18 }
  0x28   :  { %p745_p3 = scmp.lt.u32.totalorder %s741_s21, %s932_s2 }
  0x2a   :  { %p747_p4 = pnand %p745_p3, %p742_p2 }
  0x2c   :  { %750 = shalt.err (!%p747_p4)
}
  0x2d   :  { %s751_s28 = scalar_lea.vmem %s42_s18, 3072  ;;  %p756_p6 = scmp.lt.s32.totalorder %s42_s18, %s42_s18 }
  0x2e   :  { %p752_p5 = scmp.ne.s32.totalorder %s42_s18, %s751_s28  ;;  %p757_p7 = scmp.lt.s32.totalorder %s751_s28, %s751_s28 }
  0x30   :  { %p758_p8 = por %p757_p7, %p756_p6 }
  0x32   :  { %p759_p9 = pnand %p758_p8, %p752_p5 }
  0x34   :  { %762 = shalt.err (!%p759_p9)
}
  0x35   :  { %47 = dma.hbm_to_vmem [thread:$0]  %s932_s2, 3072, %s42_s18, [#allocation6], %s792_s25, %s792_s25, %s793_s26  }
  0x36   :  { %785 = dma.done.wait [#allocation3], 256  }
  0x37   :  { %786 = vsyncadd [#allocation3], 4294967040 }
  0x38   :  { %787 = dma.done.wait [#allocation6], 3328  }
  0x39   :  { %788 = vsyncadd [#allocation6], 4294963968  ;;  %v798_v0 = vmov 0.0   ;;  %vm799_vm0 = vmmov 0   ;;  %v671_v1 = vld [vmem:[#allocation5] sm:$0xff]   ;;  %v672_v2 = vld [vmem:[#allocation5 + $0x8] sm:$0xff]  }
  0x3a   :  { %590 = vmatprep.subr.bf16.mxu0 %v798_v0  ;;  %594 = vmatprep.mubr.msk.bf16.mxu0 %vm799_vm0, %v798_v0  ;;  %v60_v3 = vld [vmem:[#allocation2] sm:$0xff]  ;;  %v61_v4 = vld [vmem:[#allocation2 + $0x8] sm:$0xff]  ;;  %vm84_vm1 = vcmask 261120   ;;  %v675_v8 = vld [vmem:[#allocation7 + $0x10] sm:$0xff]  }
  0x3b   :  { %598 = vmatprep.subr.bf16.mxu1 %v798_v0  ;;  %614 = vmatprep.mubr.msk.bf16.mxu1 %vm799_vm0, %v798_v0  ;;  %v673_v5 = vld [vmem:[#allocation7] sm:$0xff]   ;;  %v62_v6 = vpack.c.bf16 %v61_v4, %v60_v3  ;;  %v674_v7 = vld [vmem:[#allocation7 + $0x8] sm:$0xff]   ;;  %v676_v9 = vld [vmem:[#allocation7 + $0x18] sm:$0xff]   ;;  %v800_v3 = vmov 127  }
  0x3c   :  { %591 = vmatpush3.bf16.msra.mxu0 %v671_v1  ;;  %599 = vmatpush3.bf16.msra.mxu1 %v673_v5  ;;  %v677_v10 = vld [vmem:[#allocation7 + $0x20] sm:$0xff]   ;;  %v678_v11 = vld [vmem:[#allocation7 + $0x28] sm:$0xff]   ;;  %v679_v12 = vld [vmem:[#allocation7 + $0x30] sm:$0xff]  }
  0x3d   :  { %592 = vmatprep.subr.bf16.mxu0 %v798_v0  ;;  %600 = vmatprep.subr.bf16.mxu1 %v798_v0  ;;  %v680_v13 = vld [vmem:[#allocation7 + $0x38] sm:$0xff]   ;;  %v681_v14 = vld [vmem:[#allocation7 + $0x40] sm:$0xff]   ;;  %v682_v15 = vld [vmem:[#allocation7 + $0x48] sm:$0xff]  }
  0x3e   :  { %v683_v16 = vld [vmem:[#allocation7 + $0x50] sm:$0xff]   ;;  %v684_v17 = vld [vmem:[#allocation7 + $0x58] sm:$0xff]   ;;  %v685_v18 = vld [vmem:[#allocation7 + $0x60] sm:$0xff]   ;;  %669 = vset.pattern.permute.xlu1 %v800_v3  ;;  %670 = vset.pattern.permute.xlu0 %v800_v3 }
  0x3f   :  { %v686_v19 = vld [vmem:[#allocation7 + $0x68] sm:$0xff]   ;;  %v520_v20 = vld [vmem:[%s933_s3] ss:$0 sm:$0xff]  ;;  %v687_v30 = vld [vmem:[#allocation7 + $0x70] sm:$0xff]  }
  0x40   :  { %593 = vmatpush3.bf16.msra.mxu0 %v672_v2  ;;  %601 = vmatpush3.bf16.msra.mxu1 %v674_v7  ;;  %v688_v31 = vld [vmem:[#allocation7 + $0x78] sm:$0xff]   ;;  %v689_v32 = vld [vmem:[#allocation7 + $0x80] sm:$0xff]   ;;  %v690_v33 = vld [vmem:[#allocation7 + $0x88] sm:$0xff]  }
  0x41   :  { %618 = vmatprep.subr.bf16.mxu0 %v798_v0  ;;  %602 = vmatprep.subr.bf16.mxu1 %v798_v0  ;;  %v691_v34 = vld [vmem:[#allocation7 + $0x90] sm:$0xff]   ;;  %v692_v35 = vld [vmem:[#allocation7 + $0x98] sm:$0xff]   ;;  %v693_v36 = vld [vmem:[#allocation7 + $0xa0] sm:$0xff]  }
  0x42   :  { %v694_v37 = vld [vmem:[#allocation7 + $0xa8] sm:$0xff]   ;;  %v524_v38 = vld [vmem:[%s933_s3 + $0x1] ss:$0 sm:$0xff]  ;;  %v695_v48 = vld [vmem:[#allocation7 + $0xb0] sm:$0xff]  }
  0x43   :  { %595 = vmatmul.mubr.msk.bf16.vlgmr.msra.gmra.mrb[0].mxu0 %vm84_vm1, %v62_v6  ;;  %v696_v49 = vld [vmem:[#allocation7 + $0xb8] sm:$0xff]   ;;  %v533_v50 = vld [vmem:[%s933_s3 + $0x2] ss:$0 sm:$0xff]  ;;  %v542_v60 = vld [vmem:[%s933_s3 + $0x3] ss:$0 sm:$0xff]  ;;  %s801_s3 = smov [#allocation8]  }
  0x44   :  { %634 = vmatprep.mubr.msk.bf16.mxu0 %vm799_vm0, %v798_v0  ;;  %603 = vmatpush3.bf16.msra.mxu1 %v675_v8  ;;  %s507_s11 = sshll.u32 %s801_s3, 4  ;;  %s508_s11 = int_to_ptr.vmem [resolvable:$true] %s507_s11 }
  0x45   :  { %604 = vmatprep.subr.bf16.mxu1 %v798_v0  ;;  %619 = vmatpush3.bf16.msra.mxu0 %v681_v14  ;;  %s763_s12 = scalar_lea.vmem %s508_s11, 128  ;;  %p768_p11 = scmp.lt.s32.totalorder %s508_s11, %s508_s11 }
  0x46   :  { %620 = vmatprep.subr.bf16.mxu0 %v798_v0  ;;  %p764_p10 = scmp.ne.s32.totalorder %s508_s11, %s763_s12  ;;  %p769_p12 = scmp.lt.s32.totalorder %s763_s12, %s763_s12 }
  0x48   :  { %605 = vmatpush3.bf16.msra.mxu1 %v676_v9  ;;  %p770_p13 = por %p769_p12, %p768_p11 }
  0x49   :  { %606 = vmatprep.subr.bf16.mxu1 %v798_v0  ;;  %621 = vmatpush3.bf16.msra.mxu0 %v682_v15 }
  0x4a   :  { %622 = vmatprep.subr.bf16.mxu0 %v798_v0  ;;  %p771_p0 = pnand %p770_p13, %p764_p10 }
  0x4c   :  { %607 = vmatpush3.bf16.msra.mxu1 %v677_v10 }
  0x4d   :  { %608 = vmatprep.subr.bf16.mxu1 %v798_v0  ;;  %623 = vmatpush3.bf16.msra.mxu0 %v683_v16 }
  0x4e   :  { %624 = vmatprep.subr.bf16.mxu0 %v798_v0 }
  0x50   :  { %609 = vmatpush3.bf16.msra.mxu1 %v678_v11 }
  0x51   :  { %610 = vmatprep.subr.bf16.mxu1 %v798_v0  ;;  %625 = vmatpush3.bf16.msra.mxu0 %v684_v17 }
  0x52   :  { %626 = vmatprep.subr.bf16.mxu0 %v798_v0 }
  0x54   :  { %611 = vmatpush3.bf16.msra.mxu1 %v679_v12 }
  0x55   :  { %612 = vmatprep.subr.bf16.mxu1 %v798_v0  ;;  %627 = vmatpush3.bf16.msra.mxu0 %v685_v18 }
  0x56   :  { %628 = vmatprep.subr.bf16.mxu0 %v798_v0 }
  0x58   :  { %613 = vmatpush3.bf16.msra.mxu1 %v680_v13 }
  0x59   :  { %638 = vmatprep.subr.bf16.mxu1 %v798_v0  ;;  %629 = vmatpush3.bf16.msra.mxu0 %v686_v19 }
  0x5a   :  { %630 = vmatprep.subr.bf16.mxu0 %v798_v0 }
  0x5d   :  { %631 = vmatpush3.bf16.msra.mxu0 %v687_v30 }
  0x5e   :  { %632 = vmatprep.subr.bf16.mxu0 %v798_v0 }
  0x61   :  { %633 = vmatpush3.bf16.msra.mxu0 %v688_v31 }
 0x116   :  { %v122_v21 = vpop.f32.mrb[0].mxu0 }
 0x117   :  { %v123_v22 = vadd.f32 %v520_v20, %v122_v21  ;;  %v596_v23 = vpop.f32.mrb[1].mxu0 }
 0x118   :  { %v125_v24 = vpop.f32.mrb[2].mxu0 }
 0x119   :  { %v126_v25 = vadd.f32 %v520_v20, %v125_v24  ;;  %v597_v26 = vpop.f32.mrb[3].mxu0  ;;  %v129_v27 = vmax.f32 %v123_v22, 0.0 }
 0x11b   :  { %v130_v28 = vmax.f32 %v126_v25, 0.0 }
 0x11d   :  { %v131_v29 = vpack.c.bf16 %v130_v28, %v129_v27 }
 0x11f   :  { %615 = vmatmul.mubr.bf16.vlgmr.msra.gmra.mrb[0].mxu1 %v131_v29 }
 0x120   :  { %654 = vmatprep.mubr.msk.bf16.mxu1 %vm799_vm0, %v798_v0  ;;  %639 = vmatpush3.bf16.msra.mxu1 %v689_v32 }
 0x121   :  { %640 = vmatprep.subr.bf16.mxu1 %v798_v0 }
 0x124   :  { %641 = vmatpush3.bf16.msra.mxu1 %v690_v33 }
 0x125   :  { %642 = vmatprep.subr.bf16.mxu1 %v798_v0 }
 0x128   :  { %643 = vmatpush3.bf16.msra.mxu1 %v691_v34 }
 0x129   :  { %644 = vmatprep.subr.bf16.mxu1 %v798_v0 }
 0x12c   :  { %645 = vmatpush3.bf16.msra.mxu1 %v692_v35 }
 0x12d   :  { %646 = vmatprep.subr.bf16.mxu1 %v798_v0 }
 0x130   :  { %647 = vmatpush3.bf16.msra.mxu1 %v693_v36 }
 0x131   :  { %648 = vmatprep.subr.bf16.mxu1 %v798_v0 }
 0x134   :  { %649 = vmatpush3.bf16.msra.mxu1 %v694_v37 }
 0x135   :  { %650 = vmatprep.subr.bf16.mxu1 %v798_v0 }
 0x138   :  { %651 = vmatpush3.bf16.msra.mxu1 %v695_v48 }
 0x139   :  { %652 = vmatprep.subr.bf16.mxu1 %v798_v0 }
 0x13c   :  { %653 = vmatpush3.bf16.msra.mxu1 %v696_v49 }
 0x1f2   :  { %v235_v39 = vpop.f32.mrb[0].mxu1 }
 0x1f3   :  { %v236_v40 = vadd.f32 %v524_v38, %v235_v39  ;;  %v616_v41 = vpop.f32.mrb[1].mxu1 }
 0x1f4   :  { %v238_v42 = vpop.f32.mrb[2].mxu1 }
 0x1f5   :  { %v239_v43 = vadd.f32 %v524_v38, %v238_v42  ;;  %v617_v44 = vpop.f32.mrb[3].mxu1  ;;  %v242_v45 = vmax.f32 %v236_v40, 0.0 }
 0x1f7   :  { %v243_v46 = vmax.f32 %v239_v43, 0.0 }
 0x1f9   :  { %v244_v47 = vpack.c.bf16 %v243_v46, %v242_v45 }
 0x1fb   :  { %635 = vmatmul.mubr.bf16.vlgmr.msra.gmra.mrb[4].mxu0 %v244_v47 }
 0x2ce   :  { %v349_v51 = vpop.f32.mrb[4].mxu0 }
 0x2cf   :  { %v350_v52 = vadd.f32 %v533_v50, %v349_v51  ;;  %v636_v53 = vpop.f32.mrb[5].mxu0 }
 0x2d0   :  { %v352_v54 = vpop.f32.mrb[6].mxu0 }
 0x2d1   :  { %v353_v55 = vadd.f32 %v533_v50, %v352_v54  ;;  %v637_v56 = vpop.f32.mrb[7].mxu0  ;;  %v356_v57 = vmax.f32 %v350_v52, 0.0 }
 0x2d3   :  { %v357_v58 = vmax.f32 %v353_v55, 0.0 }
 0x2d5   :  { %v358_v59 = vpack.c.bf16 %v357_v58, %v356_v57 }
 0x2d7   :  { %655 = vmatmul.mubr.bf16.vlgmr.msra.gmra.mrb[4].mxu1 %v358_v59 }
 0x3aa   :  { %v463_v61 = vpop.f32.mrb[4].mxu1 }
 0x3ab   :  { %v464_v62 = vadd.f32 %v542_v60, %v463_v61  ;;  %v656_v63 = vpop.f32.mrb[5].mxu1 }
 0x3ac   :  { %v466_v0 = vpop.f32.mrb[6].mxu1 }
 0x3ad   :  { %470 = vadd.xlane.f32.xlu0 %v464_v62  ;;  %v657_v1 = vpop.f32.mrb[7].mxu1  ;;  %v467_v2 = vadd.f32 %v542_v60, %v466_v0 }
 0x3b1   :  { %472 = vadd.xlane.f32.xlu0 %v467_v2 }
 0x43a   :  { %v471_v4 = vpop.xlane.xlu0 %470 }
 0x43b   :  { %v474_v5 = vsub.f32 %v471_v4, %v464_v62 }
 0x43d   :  { %v476_v6 = vmul.f32 0.125, %v474_v5 }
 0x43e   :  { %v473_v7 = vpop.xlane.xlu0 %472 }
 0x43f   :  { %v475_v8 = vsub.f32 %v473_v7, %v467_v2  ;;  %v478_v9 = vsub.f32 %v464_v62, %v476_v6 }
 0x441   :  { %v477_v10 = vmul.f32 0.125, %v475_v8  ;;  %482 = vperm.xlu1 %669, %v478_v9  }
 0x443   :  { %v479_v11 = vsub.f32 %v467_v2, %v477_v10 }
 0x445   :  { %487 = vperm.xlu1 %669, %v479_v11  }
 0x4c0   :  { %v483_v12 = vpop.permute.xlu1 %482 }
 0x4c1   :  { %v490_v14 = vadd.f32 %v483_v12, %v464_v62 }
 0x4c4   :  { %v488_v13 = vpop.permute.xlu1 %487 }
 0x4c5   :  { %v491_v15 = vadd.f32 %v488_v13, %v467_v2 }
 0x4c7   :  { %v558_v16 = vpack.c.bf16 %v491_v15, %v490_v14 }
 0x4c9   :  { %559 = vst [vmem:[#allocation8] sm:$0xff] %v558_v16  }
 0x4ca   :  { %774 = shalt.err (!%p771_p0)
}
 0x4cb   :  { %s775_s14 = scalar_lea.hbm %s934_s4, 128 }
 0x4cc   :  { %p776_p1 = scmp.ne.s32.totalorder %s934_s4, %s775_s14  ;;  %p779_p2 = scmp.lt.u32.totalorder %s775_s14, %s934_s4 }
 0x4ce   :  { %p781_p3 = pnand %p779_p2, %p776_p1 }
 0x4d0   :  { %784 = shalt.err (!%p781_p3)
}
 0x4d1   :  { %513 = dma.vmem_to_hbm [thread:$0]  %s508_s11, 128, %s934_s4, [#allocation4], %s792_s25, %s792_s25, %s793_s26  }
 0x4d2   :  { %789 = dma.done.wait [#allocation4], 128  }
 0x4d3   :  { %790 = vsyncadd [#allocation4], 4294967168 }
 0x4d4   :  { %517 = vsyncpa [#allocation3], 1 }
 0x4d5   :  { %518 = vsyncpa [#allocation6], 1 }
 0x4d6   :  { %519 = vsyncpa [#allocation4], 1 }

</bundles_post_ra>
